<compile_context>
chip_gen: v7x
topology: tpu7x:2x2x1
jax: 0.10.0
libtpu: 0.0.40
codegen_flags: <defaults>
</compile_context>

<pallas_src>
import functools
import math

import jax
import jax.numpy as jnp
import numpy as np
from jax.experimental import pallas as pl
from jax.experimental.pallas import tpu as pltpu


def _round_up(a, b):
    return (a + b - 1) // b * b


# ---------------------------------------------------------------------------
# Kernel 1: GatedGCN local model + GPS norm1_local + fused q/k/v projection.
# Grid: edge blocks ("arbitrary"); node-side state resident/accumulated in VMEM.
# ---------------------------------------------------------------------------
def gated_gcn_kernel(x_ref, e_ref, src_oh_ref, dst_oh_ref,
                     w7_ref, b7_ref, wc_ref, bc_ref,
                     bnx_s_ref, bnx_b_ref, bne_s_ref, bne_b_ref,
                     n1l_s_ref, n1l_b_ref,
                     nodes_ref, e_out_ref,
                     xw_scr, acc_scr, *, n_nodes, pad_rows):
    f32 = jnp.float32
    H = x_ref.shape[-1]
    i = pl.program_id(0)

    @pl.when(i == 0)
    def _():
        # Fused node projections [Ax | Dx | Bx | Ex | q*scale | k | v],
        # computed once at full M=N and kept resident across edge blocks.
        xw_scr[...] = (jnp.dot(x_ref[...], w7_ref[...],
                               preferred_element_type=f32) + b7_ref[...])
        acc_scr[...] = jnp.zeros_like(acc_scr)

    xw = xw_scr[...]
    Dx = xw[:, H:2 * H]
    BE = xw[:, 2 * H:4 * H]

    # one bf16 incidence per direction (half the HBM bytes); 0/1 exact after upcast
    src_oh = src_oh_ref[...].astype(f32)          # [Eb, N]
    dst_oh = dst_oh_ref[...].astype(f32)          # [Eb, N]

    # gathers to this edge block (one-hot matmuls, Bx/Ex gathered together)
    Dx_i = jnp.dot(dst_oh, Dx, preferred_element_type=f32)        # [Eb, H]
    BE_j = jnp.dot(src_oh, BE, preferred_element_type=f32)        # [Eb, 2H]
    Bx_j = BE_j[:, 0:H]
    Ex_j = BE_j[:, H:2 * H]

    e_blk = e_ref[...]
    Ce = jnp.dot(e_blk, wc_ref[...], preferred_element_type=f32) + bc_ref[...]
    e_ij = Dx_i + Ex_j + Ce
    sigma = jax.nn.sigmoid(e_ij)

    # fused scatter-add of [sigma*Bx_j | sigma] into the node accumulator:
    # contraction over the edge dim of the SAME [Eb,N] incidence (no transpose,
    # no second incidence copy in VMEM).
    scat = jnp.concatenate([sigma * Bx_j, sigma], axis=-1)        # [Eb, 2H]
    acc_scr[...] += jax.lax.dot_general(
        dst_oh, scat, dimension_numbers=(((0,), (0,)), ((), ())),
        preferred_element_type=f32)                               # [N, 2H]

    e_new = jnp.maximum(e_ij * bne_s_ref[...] + bne_b_ref[...], 0.0)   # BN(eval)+ReLU
    e_out_ref[...] = (e_blk + e_new).astype(e_out_ref.dtype)           # residual

    @pl.when(i == pl.num_programs(0) - 1)
    def _():
        x = x_ref[...]
        Ax = xw[:, 0:H]
        nd = acc_scr[...]
        aggr = nd[:, 0:H] / (nd[:, H:2 * H] + 1e-6)               # exact divide
        x_new = jnp.maximum((Ax + aggr) * bnx_s_ref[...] + bnx_b_ref[...], 0.0)
        h_local = (x + x_new) * n1l_s_ref[...] + n1l_b_ref[...]   # residual + norm1_local
        nodes = jnp.concatenate([x, h_local, xw[:, 4 * H:7 * H]], axis=-1)
        nodes_ref[0:n_nodes, :] = nodes.astype(nodes_ref.dtype)
        # zero the pad rows so the last graph's fixed-size DMA never sees
        # uninitialized (possibly NaN) memory through masked keys.
        nodes_ref[n_nodes:n_nodes + pad_rows, :] = jnp.zeros(
            (pad_rows, 5 * H), nodes_ref.dtype)


# ---------------------------------------------------------------------------
# Kernel 2: dense-batch MHA + attn residual + norm1_attn + branch sum + FF + norm2.
# One graph per grid step; [x|h_local|q|k|v] slabs are pulled with a
# double-buffered manual DMA at scalar-prefetched node offsets, and the result
# is written straight back to the flat node layout.
# ---------------------------------------------------------------------------
def attn_combine_ff_kernel(off_ref, cnt_ref,
                           nodes_hbm,
                           wo_ref, bo_ref,
                           n1a_s_ref, n1a_b_ref,
                           w1_ref, b1_ref, w2_ref, b2_ref,
                           n2_s_ref, n2_b_ref,
                           out_hbm,
                           buf, obuf, in_sem, out_sem, *, num_heads):
    f32 = jnp.float32
    S = buf.shape[1]
    H = buf.shape[2] // 5
    hd = H // num_heads

    g = pl.program_id(0)
    n_g = pl.num_programs(0)

    def fetch(idx, slot):
        pltpu.make_async_copy(nodes_hbm.at[pl.ds(off_ref[idx], S)],
                              buf.at[slot], in_sem.at[slot]).start()

    @pl.when(g == 0)
    def _():
        fetch(0, 0)

    slot = jax.lax.rem(g, 2)
    # wait for this graph's slab (started either above or as last step's prefetch)
    pltpu.make_async_copy(nodes_hbm.at[pl.ds(0, S)], buf.at[slot],
                          in_sem.at[slot]).wait()

    # prefetch the next graph while we compute this one (double buffering)
    @pl.when(g + 1 < n_g)
    def _():
        fetch(g + 1, 1 - slot)

    nb = buf[slot]                               # [S, 5H]
    x = nb[:, 0:H]
    hl = nb[:, H:2 * H]
    q = nb[:, 2 * H:3 * H]                       # 1/sqrt(hd) already folded into Wq/bq
    k = nb[:, 3 * H:4 * H]
    v = nb[:, 4 * H:5 * H]

    cnt = cnt_ref[g]
    key_pos = jax.lax.broadcasted_iota(jnp.int32, (1, S), 1)
    kbias = jnp.where(key_pos < cnt, 0.0, -1e9).astype(f32)      # [1, S]

    # per-head attention via full-width lane-masked matmuls (no 8-lane slices),
    # q @ k^T as an NT dot_general (no explicit transpose).
    lane = jax.lax.broadcasted_iota(jnp.int32, (1, H), 1)
    o = jnp.zeros((S, H), f32)
    for h in range(num_heads):
        m = ((lane >= h * hd) & (lane < (h + 1) * hd)).astype(f32)     # [1, H]
        s = jax.lax.dot_general(q * m, k, (((1,), (1,)), ((), ())),
                                preferred_element_type=f32) + kbias    # [S, S]
        p = jnp.exp(s - jnp.max(s, axis=-1, keepdims=True))
        p = p / jnp.sum(p, axis=-1, keepdims=True)                     # exact softmax
        o = o + jnp.dot(p, v * m, preferred_element_type=f32)

    attn = jnp.dot(o, wo_ref[...], preferred_element_type=f32) + bo_ref[...]
    h_attn = (x + attn) * n1a_s_ref[...] + n1a_b_ref[...]        # residual + norm1_attn
    hsum = hl + h_attn                                           # sum(h_out_list)

    ff = jnp.maximum(jnp.dot(hsum, w1_ref[...], preferred_element_type=f32)
                     + b1_ref[...], 0.0)
    ff = jnp.dot(ff, w2_ref[...], preferred_element_type=f32) + b2_ref[...]
    res = (hsum + ff) * n2_s_ref[...] + n2_b_ref[...]            # FF residual + norm2

    obuf[...] = res.astype(obuf.dtype)
    # flat writeback into the [N+S, H] node layout. Graphs run in ascending
    # node order (sequential "arbitrary" grid) and we wait on the write before
    # the next (overlapping) one starts, so pad-row spill from graph g is
    # overwritten by graph g+1's valid rows.
    wr = pltpu.make_async_copy(obuf, out_hbm.at[pl.ds(off_ref[g], S)],
                               out_sem.at[0])
    wr.start()
    wr.wait()


# ---------------------------------------------------------------------------
# Wrapper
# ---------------------------------------------------------------------------
def gps_layer_forward(x, edge_attr, edge_index, batch_vec, params, *,
                      num_heads, num_graphs, max_nodes):
    N, H = x.shape
    E = edge_attr.shape[0]
    G, S = num_graphs, max_nodes
    src, dst = edge_index[0], edge_index[1]
    hd = H // num_heads
    scale = 1.0 / math.sqrt(hd)

    # ---------------- local GatedGCN branch + fused qkv (kernel 1) ----------------
    EB = min(512, _round_up(E, 16))          # edge block (sublane/pack friendly)
    E_pad = _round_up(E, EB)
    n_eb = E_pad // EB

    src_oh = jax.nn.one_hot(src, N, dtype=jnp.bfloat16)      # [E, N]
    dst_oh = jax.nn.one_hot(dst, N, dtype=jnp.bfloat16)      # [E, N]
    if E_pad != E:
        zoh = jnp.zeros((E_pad - E, N), jnp.bfloat16)
        src_oh = jnp.concatenate([src_oh, zoh], axis=0)
        dst_oh = jnp.concatenate([dst_oh, zoh], axis=0)
        edge_attr_p = jnp.concatenate(
            [edge_attr, jnp.zeros((E_pad - E, H), edge_attr.dtype)], axis=0)
    else:
        edge_attr_p = edge_attr

    # fused node matmul [Ax | Dx | Bx | Ex | q*scale | k | v]; the attention
    # scale is folded into Wq/bq so kernel 2 never multiplies the scores.
    w7 = jnp.concatenate([params['WA'], params['WD'], params['WB'], params['WE'],
                          params['Wq'] * scale, params['Wk'], params['Wv']], axis=1)
    b7 = jnp.concatenate([params['bA'], params['bD'], params['bB'], params['bE'],
                          params['bq'] * scale, params['bk'], params['bv']], axis=1)

    def res1(shape):
        return pl.BlockSpec(shape, lambda i: (0,) * len(shape))

    # per-step working-set estimate, capped well below v7x's 64 MiB physical VMEM
    est = (4 * EB * N * 2            # double-buffered one-hot blocks (bf16)
           + 2 * EB * H * 4 * 2      # edge_attr in / e_out blocks
           + 4 * N * 10 * H          # resident x + xw(7H) + acc(2H) scratch
           + 4 * (N + S) * 5 * H     # nodes output
           + 4 * 10 * H * H)         # weights
    vmem1 = int(min(48 * 2 ** 20, max(16 * 2 ** 20, 4 * est)))

    # TODO(synk): for production graph sizes the [E,N] one-hot gather/scatter
    # should become index-driven (scalar-prefetched src/dst, per-edge-block DMA
    # gathers, node-block accumulation); Mosaic has no in-kernel dynamic
    # scatter-add, so the segment-sum stays a blocked one-hot matmul here.
    nodes_pad, e_out_p = pl.pallas_call(
        functools.partial(gated_gcn_kernel, n_nodes=N, pad_rows=S),
        grid_spec=pltpu.PrefetchScalarGridSpec(
            num_scalar_prefetch=0,
            grid=(n_eb,),
            in_specs=[
                res1((N, H)),                                  # x (resident)
                pl.BlockSpec((EB, H), lambda i: (i, 0)),       # edge_attr block
                pl.BlockSpec((EB, N), lambda i: (i, 0)),       # src one-hot block
                pl.BlockSpec((EB, N), lambda i: (i, 0)),       # dst one-hot block
                res1((H, 7 * H)), res1((1, 7 * H)),            # fused node W/b
                res1((H, H)), res1((1, H)),                    # WC, bC
                res1((1, H)), res1((1, H)),                    # bn node (folded)
                res1((1, H)), res1((1, H)),                    # bn edge (folded)
                res1((1, H)), res1((1, H)),                    # norm1_local (folded)
            ],
            out_specs=[
                res1((N + S, 5 * H)),                          # [x|h_local|q|k|v] (+pad)
                pl.BlockSpec((EB, H), lambda i: (i, 0)),       # e_out block
            ],
            scratch_shapes=[pltpu.VMEM((N, 7 * H), jnp.float32),
                            pltpu.VMEM((N, 2 * H), jnp.float32)],
        ),
        out_shape=(jax.ShapeDtypeStruct((N + S, 5 * H), jnp.float32),
                   jax.ShapeDtypeStruct((E_pad, H), x.dtype)),
        compiler_params=pltpu.CompilerParams(
            dimension_semantics=("arbitrary",), vmem_limit_bytes=vmem1),
    )(x, edge_attr_p, src_oh, dst_oh, w7, b7,
      params['WC'], params['bC'],
      params['bnx_s'], params['bnx_b'], params['bne_s'], params['bne_b'],
      params['n1l_s'], params['n1l_b'])
    e_out = e_out_p[:E]

    # ---------------- global attention + combine + FF (kernel 2) ----------------
    counts = jnp.zeros((G,), jnp.int32).at[batch_vec].add(1)
    offsets = jnp.concatenate(
        [jnp.zeros((1,), jnp.int32), jnp.cumsum(counts)[:-1].astype(jnp.int32)])

    def res2(shape):
        return pl.BlockSpec(shape, lambda g, off, cnt: (0,) * len(shape))

    h_pad = pl.pallas_call(
        functools.partial(attn_combine_ff_kernel, num_heads=num_heads),
        grid_spec=pltpu.PrefetchScalarGridSpec(
            num_scalar_prefetch=2,
            grid=(G,),
            in_specs=[
                pl.BlockSpec(memory_space=pl.ANY),             # nodes_pad (HBM, manual DMA)
                res2((H, H)), res2((1, H)),                    # Wo, bo
                res2((1, H)), res2((1, H)),                    # norm1_attn (folded)
                res2((H, 2 * H)), res2((1, 2 * H)),            # W1, b1
                res2((2 * H, H)), res2((1, H)),                # W2, b2
                res2((1, H)), res2((1, H)),                    # norm2 (folded)
            ],
            out_specs=pl.BlockSpec(memory_space=pl.ANY),       # flat [N+S, H] (HBM)
            scratch_shapes=[pltpu.VMEM((2, S, 5 * H), jnp.float32),
                            pltpu.VMEM((S, H), x.dtype),
                            pltpu.SemaphoreType.DMA((2,)),
                            pltpu.SemaphoreType.DMA((1,))],
        ),
        out_shape=jax.ShapeDtypeStruct((N + S, H), x.dtype),
        # sequential grid so the overlapping flat writebacks land in ascending
        # graph order; on v7x this trades megacore sharding of the graph axis
        # for the gather-free flat output layout.
        compiler_params=pltpu.CompilerParams(dimension_semantics=("arbitrary",)),
    )(offsets, counts, nodes_pad,
      params['Wo'], params['bo'],
      params['n1a_s'], params['n1a_b'],
      params['W1'], params['b1'], params['W2'], params['b2'],
      params['n2_s'], params['n2_b'])

    return h_pad[:N], e_out


# ---------------------------------------------------------------------------
# Pure-JAX reference (mirrors the PyTorch forward, eval mode) for verification
# ---------------------------------------------------------------------------
def reference_forward(x, edge_attr, edge_index, batch_vec, params, *,
                      num_heads, num_graphs, max_nodes):
    N, H = x.shape
    src, dst = edge_index[0], edge_index[1]
    Ax = x @ params['WA'] + params['bA']
    Bx = x @ params['WB'] + params['bB']
    Ce = edge_attr @ params['WC'] + params['bC']
    Dx = x @ params['WD'] + params['bD']
    Ex = x @ params['WE'] + params['bE']
    e_ij = Dx[dst] + Ex[src] + Ce
    sigma = jax.nn.sigmoid(e_ij)
    num = jnp.zeros((N, H)).at[dst].add(sigma * Bx[src])
    den = jnp.zeros((N, H)).at[dst].add(sigma)
    x_new = Ax + num / (den + 1e-6)
    x_new = jnp.maximum(x_new * params['bnx_s'] + params['bnx_b'], 0.0)
    h_local = (x + x_new) * params['n1l_s'] + params['n1l_b']
    e_out = edge_attr + jnp.maximum(e_ij * params['bne_s'] + params['bne_b'], 0.0)

    counts = jnp.zeros((num_graphs,), jnp.int32).at[batch_vec].add(1)
    offsets = jnp.concatenate([jnp.zeros((1,), jnp.int32), jnp.cumsum(counts)[:-1]])
    pos = jnp.arange(N, dtype=jnp.int32) - offsets[batch_vec]
    dense = jnp.zeros((num_graphs, max_nodes, H)).at[batch_vec, pos].set(x)
    mask = jnp.zeros((num_graphs, max_nodes), bool).at[batch_vec, pos].set(True)
    kbias = jnp.where(mask, 0.0, -1e9)

    hd = H // num_heads
    def split(t):
        return t.reshape(num_graphs, max_nodes, num_heads, hd).transpose(0, 2, 1, 3)
    q = split(dense @ params['Wq'] + params['bq'])
    k = split(dense @ params['Wk'] + params['bk'])
    v = split(dense @ params['Wv'] + params['bv'])
    s = jnp.einsum('ghqd,ghkd->ghqk', q, k) / math.sqrt(hd) + kbias[:, None, None, :]
    p = jax.nn.softmax(s, axis=-1)
    o = jnp.einsum('ghqk,ghkd->ghqd', p, v).transpose(0, 2, 1, 3).reshape(
        num_graphs, max_nodes, H)
    attn_dense = o @ params['Wo'] + params['bo']

    h_attn = x + attn_dense[batch_vec, pos]
    h_attn = h_attn * params['n1a_s'] + params['n1a_b']
    h = h_local + h_attn
    ff = jnp.maximum(h @ params['W1'] + params['b1'], 0.0) @ params['W2'] + params['b2']
    h = h + ff
    h = h * params['n2_s'] + params['n2_b']
    return h, e_out


if __name__ == "__main__":
    H = 32            # dim_h
    NUM_HEADS = 4
    graph_sizes = (6, 8)
    G = len(graph_sizes)
    S = max(graph_sizes)                     # max nodes per graph
    N = sum(graph_sizes)                     # 14 nodes total
    EPG = 12
    E = EPG * G                              # 24 edges total

    key = jax.random.PRNGKey(0)
    keys = list(jax.random.split(key, 64))
    _ki = iter(keys)

    def nxt():
        return next(_ki)

    def w(shape, scale=0.2):
        return (scale * jax.random.normal(nxt(), shape)).astype(jnp.float32)

    def bn_fold(H_):
        gamma = 1.0 + 0.1 * jax.random.normal(nxt(), (H_,))
        beta = 0.1 * jax.random.normal(nxt(), (H_,))
        mean = 0.1 * jax.random.normal(nxt(), (H_,))
        var = jnp.abs(jax.random.normal(nxt(), (H_,))) * 0.5 + 0.5
        s = gamma / jnp.sqrt(var + 1e-5)
        b = beta - mean * s
        return s.reshape(1, -1).astype(jnp.float32), b.reshape(1, -1).astype(jnp.float32)

    params = {}
    # GatedGCN linears A..E
    for name in ['A', 'B', 'C', 'D', 'E']:
        params['W' + name] = w((H, H))
        params['b' + name] = w((1, H))
    # GatedGCN batch norms (node / edge), GPS norms, folded to scale/shift
    params['bnx_s'], params['bnx_b'] = bn_fold(H)
    params['bne_s'], params['bne_b'] = bn_fold(H)
    params['n1l_s'], params['n1l_b'] = bn_fold(H)
    params['n1a_s'], params['n1a_b'] = bn_fold(H)
    params['n2_s'], params['n2_b'] = bn_fold(H)
    # Multi-head attention projections (applied as x @ W)
    for name in ['q', 'k', 'v', 'o']:
        params['W' + name] = w((H, H))
        params['b' + name] = w((1, H))
    # Feed-forward
    params['W1'] = w((H, 2 * H))
    params['b1'] = w((1, 2 * H))
    params['W2'] = w((2 * H, H))
    params['b2'] = w((1, H))

    # Inputs
    x = (0.5 * jax.random.normal(nxt(), (N, H))).astype(jnp.float32)
    edge_attr = (0.5 * jax.random.normal(nxt(), (E, H))).astype(jnp.float32)
    batch_vec = jnp.array([0] * graph_sizes[0] + [1] * graph_sizes[1], dtype=jnp.int32)
    # nodes must be sorted/contiguous by graph (PyG Batch layout)
    assert np.all(np.diff(np.asarray(batch_vec)) >= 0)
    src0 = jax.random.randint(nxt(), (EPG,), 0, graph_sizes[0])
    dst0 = jax.random.randint(nxt(), (EPG,), 0, graph_sizes[0])
    src1 = graph_sizes[0] + jax.random.randint(nxt(), (EPG,), 0, graph_sizes[1])
    dst1 = graph_sizes[0] + jax.random.randint(nxt(), (EPG,), 0, graph_sizes[1])
    edge_index = jnp.stack([jnp.concatenate([src0, src1]),
                            jnp.concatenate([dst0, dst1])]).astype(jnp.int32)

    h_out, e_out = gps_layer_forward(
        x, edge_attr, edge_index, batch_vec, params,
        num_heads=NUM_HEADS, num_graphs=G, max_nodes=S)
    h_out, e_out = jax.block_until_ready((h_out, e_out))

    h_ref, e_ref = reference_forward(
        x, edge_attr, edge_index, batch_vec, params,
        num_heads=NUM_HEADS, num_graphs=G, max_nodes=S)

    np.testing.assert_allclose(np.asarray(h_out), np.asarray(h_ref), rtol=2e-3, atol=2e-3)
    np.testing.assert_allclose(np.asarray(e_out), np.asarray(e_ref), rtol=2e-3, atol=2e-3)

    print("KERNEL_OK")
</pallas_src>

<mosaic_0001>
module attributes {stable_mosaic.version = 11 : i64} {
  func.func @gated_gcn_kernel(%arg0: i32, %arg1: memref<14x32xf32, #tpu.memory_space<vmem>>, %arg2: memref<32x32xf32, #tpu.memory_space<vmem>>, %arg3: memref<32x14xbf16, #tpu.memory_space<vmem>>, %arg4: memref<32x14xbf16, #tpu.memory_space<vmem>>, %arg5: memref<32x224xf32, #tpu.memory_space<vmem>>, %arg6: memref<1x224xf32, #tpu.memory_space<vmem>>, %arg7: memref<32x32xf32, #tpu.memory_space<vmem>>, %arg8: memref<1x32xf32, #tpu.memory_space<vmem>>, %arg9: memref<1x32xf32, #tpu.memory_space<vmem>>, %arg10: memref<1x32xf32, #tpu.memory_space<vmem>>, %arg11: memref<1x32xf32, #tpu.memory_space<vmem>>, %arg12: memref<1x32xf32, #tpu.memory_space<vmem>>, %arg13: memref<1x32xf32, #tpu.memory_space<vmem>>, %arg14: memref<1x32xf32, #tpu.memory_space<vmem>>, %arg15: memref<22x160xf32, #tpu.memory_space<vmem>>, %arg16: memref<32x32xf32, #tpu.memory_space<vmem>>, %arg17: memref<14x224xf32, #tpu.memory_space<vmem>>, %arg18: memref<14x64xf32, #tpu.memory_space<vmem>>) attributes {dimension_semantics = [#tpu.dimension_semantics<arbitrary>], iteration_bounds = array<i64: 1>, scalar_prefetch = 0 : i64, scratch_operands = 2 : i64, tpu.core_type = #tpu.core_type<tc>, window_params = [{pipeline_mode = #tpu.pipeline_mode<synchronous>, transform_indices = @transform_0, window_bounds = array<i64: 14, 32>}, {transform_indices = @transform_1, window_bounds = array<i64: 32, 32>}, {transform_indices = @transform_2, window_bounds = array<i64: 32, 14>}, {transform_indices = @transform_3, window_bounds = array<i64: 32, 14>}, {pipeline_mode = #tpu.pipeline_mode<synchronous>, transform_indices = @transform_4, window_bounds = array<i64: 32, 224>}, {pipeline_mode = #tpu.pipeline_mode<synchronous>, transform_indices = @transform_5, window_bounds = array<i64: 1, 224>}, {pipeline_mode = #tpu.pipeline_mode<synchronous>, transform_indices = @transform_6, window_bounds = array<i64: 32, 32>}, {pipeline_mode = #tpu.pipeline_mode<synchronous>, transform_indices = @transform_7, window_bounds = array<i64: 1, 32>}, {pipeline_mode = #tpu.pipeline_mode<synchronous>, transform_indices = @transform_8, window_bounds = array<i64: 1, 32>}, {pipeline_mode = #tpu.pipeline_mode<synchronous>, transform_indices = @transform_9, window_bounds = array<i64: 1, 32>}, {pipeline_mode = #tpu.pipeline_mode<synchronous>, transform_indices = @transform_10, window_bounds = array<i64: 1, 32>}, {pipeline_mode = #tpu.pipeline_mode<synchronous>, transform_indices = @transform_11, window_bounds = array<i64: 1, 32>}, {pipeline_mode = #tpu.pipeline_mode<synchronous>, transform_indices = @transform_12, window_bounds = array<i64: 1, 32>}, {pipeline_mode = #tpu.pipeline_mode<synchronous>, transform_indices = @transform_13, window_bounds = array<i64: 1, 32>}, {pipeline_mode = #tpu.pipeline_mode<synchronous>, transform_indices = @transform_14, window_bounds = array<i64: 22, 160>}, {transform_indices = @transform_15, window_bounds = array<i64: 32, 32>}]} {
    %c0_i32 = arith.constant 0 : i32
    %0 = arith.cmpi eq, %arg0, %c0_i32 : i32
    %1 = arith.extui %0 : i1 to i32
    %c0_i32_0 = arith.constant 0 : i32
    %2 = arith.cmpi ne, %1, %c0_i32_0 : i32
    scf.if %2 {
      %c0_29 = arith.constant 0 : index
      %c0_30 = arith.constant 0 : index
      %46 = vector.load %arg1[%c0_29, %c0_30] : memref<14x32xf32, #tpu.memory_space<vmem>>, vector<14x32xf32>
      %c0_31 = arith.constant 0 : index
      %c0_32 = arith.constant 0 : index
      %47 = vector.load %arg5[%c0_31, %c0_32] : memref<32x224xf32, #tpu.memory_space<vmem>>, vector<32x224xf32>
      %cst_33 = arith.constant dense<0.000000e+00> : vector<14x224xf32>
      %48 = tpu.matmul %46, %47, %cst_33 {dimension_numbers = #tpu.dot_dimension_numbers<[1], [0], [0], [1], [0, 0, 1, 1], [], []>} : vector<14x32xf32>, vector<32x224xf32>, vector<14x224xf32> -> vector<14x224xf32>
      %c0_34 = arith.constant 0 : index
      %c0_35 = arith.constant 0 : index
      %49 = vector.load %arg6[%c0_34, %c0_35] : memref<1x224xf32, #tpu.memory_space<vmem>>, vector<1x224xf32>
      %50 = vector.broadcast %49 : vector<1x224xf32> to vector<14x224xf32>
      %51 = arith.addf %48, %50 : vector<14x224xf32>
      %c0_36 = arith.constant 0 : index
      %c0_37 = arith.constant 0 : index
      %52 = vector.load %arg17[%c0_36, %c0_37] : memref<14x224xf32, #tpu.memory_space<vmem>>, vector<14x224xf32>
      tpu.vector_store %arg17[%c0_36, %c0_37], %51 {strides = array<i32>} : memref<14x224xf32, #tpu.memory_space<vmem>>, vector<14x224xf32>,
      %cst_38 = arith.constant 0.000000e+00 : f32
      %53 = vector.broadcast %cst_38 : f32 to vector<14x64xf32>
      %c0_39 = arith.constant 0 : index
      %c0_40 = arith.constant 0 : index
      %54 = vector.load %arg18[%c0_39, %c0_40] : memref<14x64xf32, #tpu.memory_space<vmem>>, vector<14x64xf32>
      tpu.vector_store %arg18[%c0_39, %c0_40], %53 {strides = array<i32>} : memref<14x64xf32, #tpu.memory_space<vmem>>, vector<14x64xf32>,
    } else {
    }
    %c0 = arith.constant 0 : index
    %c0_1 = arith.constant 0 : index
    %3 = vector.load %arg17[%c0, %c0_1] : memref<14x224xf32, #tpu.memory_space<vmem>>, vector<14x224xf32>
    %4 = vector.extract_strided_slice %3 {offsets = [0, 32], sizes = [14, 32], strides = [1, 1]} : vector<14x224xf32> to vector<14x32xf32>
    %5 = vector.extract_strided_slice %3 {offsets = [0, 64], sizes = [14, 64], strides = [1, 1]} : vector<14x224xf32> to vector<14x64xf32>
    %c0_2 = arith.constant 0 : index
    %c0_3 = arith.constant 0 : index
    %6 = vector.load %arg3[%c0_2, %c0_3] : memref<32x14xbf16, #tpu.memory_space<vmem>>, vector<32x14xbf16>
    %7 = arith.extf %6 : vector<32x14xbf16> to vector<32x14xf32>
    %c0_4 = arith.constant 0 : index
    %c0_5 = arith.constant 0 : index
    %8 = vector.load %arg4[%c0_4, %c0_5] : memref<32x14xbf16, #tpu.memory_space<vmem>>, vector<32x14xbf16>
    %9 = arith.extf %8 : vector<32x14xbf16> to vector<32x14xf32>
    %cst = arith.constant dense<0.000000e+00> : vector<32x32xf32>
    %10 = tpu.matmul %9, %4, %cst {dimension_numbers = #tpu.dot_dimension_numbers<[1], [0], [0], [1], [0, 0, 1, 1], [], []>} : vector<32x14xf32>, vector<14x32xf32>, vector<32x32xf32> -> vector<32x32xf32>
    %cst_6 = arith.constant dense<0.000000e+00> : vector<32x64xf32>
    %11 = tpu.matmul %7, %5, %cst_6 {dimension_numbers = #tpu.dot_dimension_numbers<[1], [0], [0], [1], [0, 0, 1, 1], [], []>} : vector<32x14xf32>, vector<14x64xf32>, vector<32x64xf32> -> vector<32x64xf32>
    %12 = vector.extract_strided_slice %11 {offsets = [0, 0], sizes = [32, 32], strides = [1, 1]} : vector<32x64xf32> to vector<32x32xf32>
    %13 = vector.extract_strided_slice %11 {offsets = [0, 32], sizes = [32, 32], strides = [1, 1]} : vector<32x64xf32> to vector<32x32xf32>
    %c0_7 = arith.constant 0 : index
    %c0_8 = arith.constant 0 : index
    %14 = vector.load %arg2[%c0_7, %c0_8] : memref<32x32xf32, #tpu.memory_space<vmem>>, vector<32x32xf32>
    %c0_9 = arith.constant 0 : index
    %c0_10 = arith.constant 0 : index
    %15 = vector.load %arg7[%c0_9, %c0_10] : memref<32x32xf32, #tpu.memory_space<vmem>>, vector<32x32xf32>
    %cst_11 = arith.constant dense<0.000000e+00> : vector<32x32xf32>
    %16 = tpu.matmul %14, %15, %cst_11 {dimension_numbers = #tpu.dot_dimension_numbers<[1], [0], [0], [1], [0, 0, 1, 1], [], []>} : vector<32x32xf32>, vector<32x32xf32>, vector<32x32xf32> -> vector<32x32xf32>
    %c0_12 = arith.constant 0 : index
    %c0_13 = arith.constant 0 : index
    %17 = vector.load %arg8[%c0_12, %c0_13] : memref<1x32xf32, #tpu.memory_space<vmem>>, vector<1x32xf32>
    %18 = vector.broadcast %17 : vector<1x32xf32> to vector<32x32xf32>
    %19 = arith.addf %16, %18 : vector<32x32xf32>
    %20 = arith.addf %10, %13 : vector<32x32xf32>
    %21 = arith.addf %20, %19 : vector<32x32xf32>
    %22 = arith.negf %21 : vector<32x32xf32>
    %23 = math.exp %22 : vector<32x32xf32>
    %cst_14 = arith.constant 1.000000e+00 : f32
    %24 = vector.broadcast %cst_14 : f32 to vector<32x32xf32>
    %25 = arith.addf %24, %23 : vector<32x32xf32>
    %26 = arith.divf %24, %25 : vector<32x32xf32>
    %27 = arith.mulf %26, %12 : vector<32x32xf32>
    %28 = tpu.concatenate %27, %26 in 1 : vector<32x32xf32>, vector<32x32xf32> -> vector<32x64xf32>
    %c0_15 = arith.constant 0 : index
    %c0_16 = arith.constant 0 : index
    %29 = vector.load %arg18[%c0_15, %c0_16] : memref<14x64xf32, #tpu.memory_space<vmem>>, vector<14x64xf32>
    %cst_17 = arith.constant dense<0.000000e+00> : vector<14x64xf32>
    %30 = tpu.matmul %9, %28, %cst_17 {dimension_numbers = #tpu.dot_dimension_numbers<[0], [0], [1], [1], [0, 1, 1, 1], [], []>} : vector<32x14xf32>, vector<32x64xf32>, vector<14x64xf32> -> vector<14x64xf32>
    %31 = arith.addf %29, %30 : vector<14x64xf32>
    %c0_18 = arith.constant 0 : index
    %c0_19 = arith.constant 0 : index
    %32 = vector.load %arg18[%c0_18, %c0_19] : memref<14x64xf32, #tpu.memory_space<vmem>>, vector<14x64xf32>
    tpu.vector_store %arg18[%c0_18, %c0_19], %31 {strides = array<i32>} : memref<14x64xf32, #tpu.memory_space<vmem>>, vector<14x64xf32>,
    %c0_20 = arith.constant 0 : index
    %c0_21 = arith.constant 0 : index
    %33 = vector.load %arg11[%c0_20, %c0_21] : memref<1x32xf32, #tpu.memory_space<vmem>>, vector<1x32xf32>
    %34 = vector.broadcast %33 : vector<1x32xf32> to vector<32x32xf32>
    %35 = arith.mulf %21, %34 : vector<32x32xf32>
    %c0_22 = arith.constant 0 : index
    %c0_23 = arith.constant 0 : index
    %36 = vector.load %arg12[%c0_22, %c0_23] : memref<1x32xf32, #tpu.memory_space<vmem>>, vector<1x32xf32>
    %37 = vector.broadcast %36 : vector<1x32xf32> to vector<32x32xf32>
    %38 = arith.addf %35, %37 : vector<32x32xf32>
    %cst_24 = arith.constant 0.000000e+00 : f32
    %39 = vector.broadcast %cst_24 : f32 to vector<32x32xf32>
    %40 = arith.maximumf %38, %39 : vector<32x32xf32>
    %41 = arith.addf %14, %40 : vector<32x32xf32>
    %c0_25 = arith.constant 0 : index
    %c0_26 = arith.constant 0 : index
    %42 = vector.load %arg16[%c0_25, %c0_26] : memref<32x32xf32, #tpu.memory_space<vmem>>, vector<32x32xf32>
    tpu.vector_store %arg16[%c0_25, %c0_26], %41 {strides = array<i32>} : memref<32x32xf32, #tpu.memory_space<vmem>>, vector<32x32xf32>,
    %c0_i32_27 = arith.constant 0 : i32
    %43 = arith.cmpi eq, %arg0, %c0_i32_27 : i32
    %44 = arith.extui %43 : i1 to i32
    %c0_i32_28 = arith.constant 0 : i32
    %45 = arith.cmpi ne, %44, %c0_i32_28 : i32
    scf.if %45 {
      %c0_29 = arith.constant 0 : index
      %c0_30 = arith.constant 0 : index
      %46 = vector.load %arg1[%c0_29, %c0_30] : memref<14x32xf32, #tpu.memory_space<vmem>>, vector<14x32xf32>
      %47 = vector.extract_strided_slice %3 {offsets = [0, 0], sizes = [14, 32], strides = [1, 1]} : vector<14x224xf32> to vector<14x32xf32>
      %c0_31 = arith.constant 0 : index
      %c0_32 = arith.constant 0 : index
      %48 = vector.load %arg18[%c0_31, %c0_32] : memref<14x64xf32, #tpu.memory_space<vmem>>, vector<14x64xf32>
      %49 = vector.extract_strided_slice %48 {offsets = [0, 0], sizes = [14, 32], strides = [1, 1]} : vector<14x64xf32> to vector<14x32xf32>
      %50 = vector.extract_strided_slice %48 {offsets = [0, 32], sizes = [14, 32], strides = [1, 1]} : vector<14x64xf32> to vector<14x32xf32>
      %cst_33 = arith.constant 9.99999997E-7 : f32
      %51 = vector.broadcast %cst_33 : f32 to vector<14x32xf32>
      %52 = arith.addf %50, %51 : vector<14x32xf32>
      %53 = arith.divf %49, %52 : vector<14x32xf32>
      %54 = arith.addf %47, %53 : vector<14x32xf32>
      %c0_34 = arith.constant 0 : index
      %c0_35 = arith.constant 0 : index
      %55 = vector.load %arg9[%c0_34, %c0_35] : memref<1x32xf32, #tpu.memory_space<vmem>>, vector<1x32xf32>
      %56 = vector.broadcast %55 : vector<1x32xf32> to vector<14x32xf32>
      %57 = arith.mulf %54, %56 : vector<14x32xf32>
      %c0_36 = arith.constant 0 : index
      %c0_37 = arith.constant 0 : index
      %58 = vector.load %arg10[%c0_36, %c0_37] : memref<1x32xf32, #tpu.memory_space<vmem>>, vector<1x32xf32>
      %59 = vector.broadcast %58 : vector<1x32xf32> to vector<14x32xf32>
      %60 = arith.addf %57, %59 : vector<14x32xf32>
      %cst_38 = arith.constant 0.000000e+00 : f32
      %61 = vector.broadcast %cst_38 : f32 to vector<14x32xf32>
      %62 = arith.maximumf %60, %61 : vector<14x32xf32>
      %63 = arith.addf %46, %62 : vector<14x32xf32>
      %c0_39 = arith.constant 0 : index
      %c0_40 = arith.constant 0 : index
      %64 = vector.load %arg13[%c0_39, %c0_40] : memref<1x32xf32, #tpu.memory_space<vmem>>, vector<1x32xf32>
      %65 = vector.broadcast %64 : vector<1x32xf32> to vector<14x32xf32>
      %66 = arith.mulf %63, %65 : vector<14x32xf32>
      %c0_41 = arith.constant 0 : index
      %c0_42 = arith.constant 0 : index
      %67 = vector.load %arg14[%c0_41, %c0_42] : memref<1x32xf32, #tpu.memory_space<vmem>>, vector<1x32xf32>
      %68 = vector.broadcast %67 : vector<1x32xf32> to vector<14x32xf32>
      %69 = arith.addf %66, %68 : vector<14x32xf32>
      %70 = vector.extract_strided_slice %3 {offsets = [0, 128], sizes = [14, 96], strides = [1, 1]} : vector<14x224xf32> to vector<14x96xf32>
      %71 = tpu.concatenate %46, %69, %70 in 1 : vector<14x32xf32>, vector<14x32xf32>, vector<14x96xf32> -> vector<14x160xf32>
      %c0_43 = arith.constant 0 : index
      %c0_44 = arith.constant 0 : index
      %72 = vector.load %arg15[%c0_43, %c0_44] : memref<22x160xf32, #tpu.memory_space<vmem>>, vector<14x160xf32>
      tpu.vector_store %arg15[%c0_43, %c0_44], %71 {strides = array<i32>} : memref<22x160xf32, #tpu.memory_space<vmem>>, vector<14x160xf32>,
      %cst_45 = arith.constant 0.000000e+00 : f32
      %73 = vector.broadcast %cst_45 : f32 to vector<8x160xf32>
      %c14 = arith.constant 14 : index
      %c0_46 = arith.constant 0 : index
      %74 = vector.load %arg15[%c14, %c0_46] : memref<22x160xf32, #tpu.memory_space<vmem>>, vector<8x160xf32>
      tpu.vector_store %arg15[%c14, %c0_46], %73 {strides = array<i32>} : memref<22x160xf32, #tpu.memory_space<vmem>>, vector<8x160xf32>,
    } else {
    }
    return
  }
  func.func @transform_0(%arg0: i32) -> (i32, i32) {
    %c0_i32 = arith.constant 0 : i32
    %c0_i32_0 = arith.constant 0 : i32
    %c0_i32_1 = arith.constant 0 : i32
    return %c0_i32, %c0_i32_0 : i32, i32
  }
  func.func @transform_1(%arg0: i32) -> (i32, i32) {
    %c0_i32 = arith.constant 0 : i32
    %c0_i32_0 = arith.constant 0 : i32
    return %arg0, %c0_i32 : i32, i32
  }
  func.func @transform_2(%arg0: i32) -> (i32, i32) {
    %c0_i32 = arith.constant 0 : i32
    %c0_i32_0 = arith.constant 0 : i32
    return %arg0, %c0_i32 : i32, i32
  }
  func.func @transform_3(%arg0: i32) -> (i32, i32) {
    %c0_i32 = arith.constant 0 : i32
    %c0_i32_0 = arith.constant 0 : i32
    return %arg0, %c0_i32 : i32, i32
  }
  func.func @transform_4(%arg0: i32) -> (i32, i32) {
    %c0_i32 = arith.constant 0 : i32
    %c0_i32_0 = arith.constant 0 : i32
    %c0_i32_1 = arith.constant 0 : i32
    return %c0_i32, %c0_i32_0 : i32, i32
  }
  func.func @transform_5(%arg0: i32) -> (i32, i32) {
    %c0_i32 = arith.constant 0 : i32
    %c0_i32_0 = arith.constant 0 : i32
    %c0_i32_1 = arith.constant 0 : i32
    return %c0_i32, %c0_i32_0 : i32, i32
  }
  func.func @transform_6(%arg0: i32) -> (i32, i32) {
    %c0_i32 = arith.constant 0 : i32
    %c0_i32_0 = arith.constant 0 : i32
    %c0_i32_1 = arith.constant 0 : i32
    return %c0_i32, %c0_i32_0 : i32, i32
  }
  func.func @transform_7(%arg0: i32) -> (i32, i32) {
    %c0_i32 = arith.constant 0 : i32
    %c0_i32_0 = arith.constant 0 : i32
    %c0_i32_1 = arith.constant 0 : i32
    return %c0_i32, %c0_i32_0 : i32, i32
  }
  func.func @transform_8(%arg0: i32) -> (i32, i32) {
    %c0_i32 = arith.constant 0 : i32
    %c0_i32_0 = arith.constant 0 : i32
    %c0_i32_1 = arith.constant 0 : i32
    return %c0_i32, %c0_i32_0 : i32, i32
  }
  func.func @transform_9(%arg0: i32) -> (i32, i32) {
    %c0_i32 = arith.constant 0 : i32
    %c0_i32_0 = arith.constant 0 : i32
    %c0_i32_1 = arith.constant 0 : i32
    return %c0_i32, %c0_i32_0 : i32, i32
  }
  func.func @transform_10(%arg0: i32) -> (i32, i32) {
    %c0_i32 = arith.constant 0 : i32
    %c0_i32_0 = arith.constant 0 : i32
    %c0_i32_1 = arith.constant 0 : i32
    return %c0_i32, %c0_i32_0 : i32, i32
  }
  func.func @transform_11(%arg0: i32) -> (i32, i32) {
    %c0_i32 = arith.constant 0 : i32
    %c0_i32_0 = arith.constant 0 : i32
    %c0_i32_1 = arith.constant 0 : i32
    return %c0_i32, %c0_i32_0 : i32, i32
  }
  func.func @transform_12(%arg0: i32) -> (i32, i32) {
    %c0_i32 = arith.constant 0 : i32
    %c0_i32_0 = arith.constant 0 : i32
    %c0_i32_1 = arith.constant 0 : i32
    return %c0_i32, %c0_i32_0 : i32, i32
  }
  func.func @transform_13(%arg0: i32) -> (i32, i32) {
    %c0_i32 = arith.constant 0 : i32
    %c0_i32_0 = arith.constant 0 : i32
    %c0_i32_1 = arith.constant 0 : i32
    return %c0_i32, %c0_i32_0 : i32, i32
  }
  func.func @transform_14(%arg0: i32) -> (i32, i32) {
    %c0_i32 = arith.constant 0 : i32
    %c0_i32_0 = arith.constant 0 : i32
    %c0_i32_1 = arith.constant 0 : i32
    return %c0_i32, %c0_i32_0 : i32, i32
  }
  func.func @transform_15(%arg0: i32) -> (i32, i32) {
    %c0_i32 = arith.constant 0 : i32
    %c0_i32_0 = arith.constant 0 : i32
    return %arg0, %c0_i32 : i32, i32
  }
}

</mosaic_0001>

<bundles_post_ra>
// kernel: tpu_custom_call.1
= control target key start
LH: loop header
LB: loop body
LE: loop exit
PB: predicated region body
PF: predicated region fallthrough
CT: control target
= control target key end

     0   :  { %21 = vsyncpa [#allocation5], 0  ;;  %s1556_s0 = inlined_call_operand.hbm [shape: f32[14,32], index: 0, kind: input, shape index: {}]   ;;  %s1557_s1 = inlined_call_operand.vmem [shape: f32[32,32], index: 1, kind: input, shape index: {}]   ;;  %s1558_s2 = inlined_call_operand.vmem [shape: bf16[32,14], index: 2, kind: input, shape index: {}]   ;;  %s1559_s3 = inlined_call_operand.vmem [shape: bf16[32,14], index: 3, kind: input, shape index: {}]   ;;  %s1560_s4 = inlined_call_operand.hbm [shape: f32[32,224], index: 4, kind: input, shape index: {}]   ;;  %s1561_s5 = inlined_call_operand.vmem [shape: f32[1,224], index: 5, kind: input, shape index: {}]   ;;  %s1562_s6 = inlined_call_operand.vmem [shape: f32[32,32], index: 6, kind: input, shape index: {}]   ;;  %s1563_s7 = inlined_call_operand.vmem [shape: f32[1,32], index: 7, kind: input, shape index: {}]   ;;  %s1564_s8 = inlined_call_operand.vmem [shape: f32[1,32], index: 8, kind: input, shape index: {}]   ;;  %s1565_s9 = inlined_call_operand.vmem [shape: f32[1,32], index: 9, kind: input, shape index: {}]   ;;  %s1566_s10 = inlined_call_operand.vmem [shape: f32[1,32], index: 10, kind: input, shape index: {}]   ;;  %s1567_s11 = inlined_call_operand.vmem [shape: f32[1,32], index: 11, kind: input, shape index: {}]   ;;  %s1568_s12 = inlined_call_operand.vmem [shape: f32[1,32], index: 12, kind: input, shape index: {}]   ;;  %s1569_s13 = inlined_call_operand.vmem [shape: f32[1,32], index: 13, kind: input, shape index: {}]   ;;  %s1570_s14 = inlined_call_operand.hbm [shape: f32[22,160], index: 14, kind: output, shape index: {0}]   ;;  %s1571_s15 = inlined_call_operand.hbm [shape: f32[32,32], index: 15, kind: output, shape index: {1}]  }
   0x1   :  { %22 = vsyncpa [#allocation8], 0 }
   0x2   :  { %23 = vsyncpa [#allocation6], 0 }
   0x3   :  { %24 = vsyncpa [#allocation11], 0  ;;  %s1209_s18 = smov [#allocation4]   ;;  %s1113_s22 = scalar_lea.hbm %s1556_s0, 256 }
   0x4   :  { %s30_s19 = sshll.u32 %s1209_s18, 4  ;;  %p1114_p0 = scmp.ne.s32.totalorder %s1556_s0, %s1113_s22  ;;  %s31_s19 = int_to_ptr.vmem [resolvable:$true] %s30_s19 }
   0x5   :  { %p1117_p1 = scmp.lt.u32.totalorder %s1113_s22, %s1556_s0 }
   0x7   :  { %p1119_p2 = pnand %p1117_p1, %p1114_p0 }
   0x9   :  { %1122 = shalt.err (!%p1119_p2)
}
   0xa   :  { %s1123_s27 = scalar_lea.vmem %s31_s19, 256  ;;  %p1128_p4 = scmp.lt.s32.totalorder %s31_s19, %s31_s19 }
   0xb   :  { %p1124_p3 = scmp.ne.s32.totalorder %s31_s19, %s1123_s27  ;;  %p1129_p5 = scmp.lt.s32.totalorder %s1123_s27, %s1123_s27 }
   0xd   :  { %p1130_p6 = por %p1129_p5, %p1128_p4 }
   0xf   :  { %p1131_p7 = pnand %p1130_p6, %p1124_p3 }
  0x11   :  { %1134 = shalt.err (!%p1131_p7)
}
  0x12   :  { %s1210_s28 = smov 128   ;;  %s1211_s29 = smov 8  }
  0x13   :  { %36 = dma.hbm_to_vmem [thread:$0]  %s1556_s0, 256, %s31_s19, [#allocation5], %s1210_s28, %s1210_s28, %s1211_s29  }
  0x14   :  { %s1212_s17 = smov [#allocation7]   ;;  %s1135_s22 = scalar_lea.hbm %s1560_s4, 1024 }
  0x15   :  { %s48_s18 = sshll.u32 %s1212_s17, 4  ;;  %p1136_p8 = scmp.ne.s32.totalorder %s1560_s4, %s1135_s22  ;;  %s49_s18 = int_to_ptr.vmem [resolvable:$true] %s48_s18 }
  0x16   :  { %p1139_p9 = scmp.lt.u32.totalorder %s1135_s22, %s1560_s4 }
  0x18   :  { %p1141_p10 = pnand %p1139_p9, %p1136_p8 }
  0x1a   :  { %1144 = shalt.err (!%p1141_p10)
}
  0x1b   :  { %s1145_s27 = scalar_lea.vmem %s49_s18, 1024  ;;  %p1150_p12 = scmp.lt.s32.totalorder %s49_s18, %s49_s18 }
  0x1c   :  { %p1146_p11 = scmp.ne.s32.totalorder %s49_s18, %s1145_s27  ;;  %p1151_p13 = scmp.lt.s32.totalorder %s1145_s27, %s1145_s27 }
  0x1e   :  { %p1152_p0 = por %p1151_p13, %p1150_p12 }
  0x20   :  { %p1153_p1 = pnand %p1152_p0, %p1146_p11 }
  0x22   :  { %1156 = shalt.err (!%p1153_p1)
}
  0x23   :  { %s1213_s0 = smov 256   ;;  %s1214_s19 = smov 16  }
  0x24   :  { %54 = dma.hbm_to_vmem [thread:$0]  %s1560_s4, 1024, %s49_s18, [#allocation8], %s1213_s0, %s1213_s0, %s1214_s19  }
  0x25   :  { %1201 = dma.done.wait [#allocation5], 256  }
  0x26   :  { %1202 = vsyncadd [#allocation5], 4294967040 }
  0x27   :  { %1203 = dma.done.wait [#allocation8], 1024  }
  0x28   :  { %1204 = vsyncadd [#allocation8], 4294966272  ;;  %v1215_v0 = vmov 0.0   ;;  %v86_v1 = vld [vmem:[#allocation7 + $0x8] sm:$0xff]  ;;  %v88_v2 = vld [vmem:[#allocation7 + $0x18] sm:$0xff]  ;;  %vm105_vm0 = vcmask 261120   ;;  %v95_v15 = vlaneseq }
  0x29   :  { %176 = vmatprep.mubr.f32.mxu0 %v1215_v0  ;;  %855 = vst [vmem:[#allocation9 + $0x10] sm:$0xc0] %v1215_v0  ;;  %858 = vst [vmem:[#allocation9 + $0x20] sm:$0x3f] %v1215_v0  ;;  %v85_v3 = vld [vmem:[#allocation7] sm:$0xff]  ;;  %v1012_v4 = vpack.c.bf16 %v88_v2, %v86_v1  ;;  %v87_v5 = vld [vmem:[#allocation7 + $0x10] sm:$0xff] }
  0x2a   :  { %v90_v6 = vld [vmem:[#allocation7 + $0x28] sm:$0xff]  ;;  %v92_v7 = vld [vmem:[#allocation7 + $0x38] sm:$0xff]  ;;  %v1014_v8 = vpack.c.bf16 %v87_v5, %v85_v3  ;;  %v89_v10 = vld [vmem:[#allocation7 + $0x20] sm:$0xff]  ;;  %v96_v16 = vshrl.u32 %v95_v15, 7  ;;  %vm190_vm1 = vcmask 785408   ;;  %vm193_vm2 = vcmask 783360  }
  0x2b   :  { %v1016_v9 = vpack.c.bf16 %v92_v7, %v90_v6  ;;  %v91_v11 = vld [vmem:[#allocation7 + $0x30] sm:$0xff]  ;;  %1013 = vmatprep.subr.bf16.mxu0 %v1012_v4  ;;  %v84_v14 = vld [vmem:[#allocation4 + $0x8] sm:$0x3f]  ;;  %v93_v18 = vld [vmem:[%s1561_s5] sm:$0x3]  ;;  %vm226_vm3 = vcmask 113664  }
  0x2c   :  { %1015 = vmatpush1.bf16.msra.mxu0 %v1014_v8  ;;  %v1018_v12 = vpack.c.bf16 %v91_v11, %v89_v10  ;;  %v1335_v13 = vld [vmem:[#allocation4] sm:$0xff]  ;;  %v97_v17 = vsub.s32 0, %v96_v16  ;;  %v101_v19 = vsub.s32 1, %v96_v16  ;;  %v924_v30 = vld [vmem:[%s1558_s2] sm:$0xff]   ;;  %s1216_s5 = smov 64   ;;  %s1217_s21 = smov 96  }
  0x2d   :  { %1017 = vmatprep.subr.bf16.mxu0 %v1016_v9  ;;  %v925_v31 = vunpack.c.l.bf16 %v924_v30  ;;  %vm239_vm4 = vcmask 1045504   ;;  %v331_v35 = vld [vmem:[%s1562_s6] sm:$0xff]  ;;  %v332_v36 = vld [vmem:[%s1562_s6 + $0x8] sm:$0xff]  ;;  %vm1218_vm5 = vmmov 1   ;;  %v333_v43 = vld [vmem:[%s1562_s6 + $0x10] sm:$0xff]  ;;  %v926_v45 = vunpack.c.h.bf16 %v924_v30 }
  0x2e   :  { %v98_v20 = vrot.slane %v93_v18, %v97_v17  ;;  %v102_v21 = vrot.slane %v93_v18, %v101_v19  ;;  %vm1362_vm6 = vmpackc.low %vm239_vm4, %vm1218_vm5  ;;  %v1026_v41 = vpack.c.bf16 %v332_v36, %v331_v35  ;;  %v939_v42 = vld [vmem:[%s1558_s2 + $0x8] sm:$0xff]   ;;  %v334_v44 = vld [vmem:[%s1562_s6 + $0x18] sm:$0xff]  ;;  %vm197_vm7 = vcmask 521216  }
  0x2f   :  { %971 = vmatprep.mubr.msk.f32.mxu1 %vm226_vm3, %v925_v31  ;;  %v929_v47 = vunpack.c.l.bf16 %v939_v42  ;;  %v1030_v48 = vpack.c.bf16 %v334_v44, %v333_v43  ;;  %v930_v51 = vunpack.c.h.bf16 %v939_v42  ;;  %v1384_v52 = vld [vmem:[%s1557_s1] sm:$0xff]  ;;  %v328_v54 = vld [vmem:[%s1557_s1 + $0x8] sm:$0xff]  ;;  %v1397_v55 = vld [vmem:[%s1557_s1 + $0x10] sm:$0xff]  ;;  %198 = vst.msk [vmem:[#allocation3 + $0x8] sm:$0x3f] %vm197_vm7, %v1215_v0  ;;  %vm195_vm8 = vcmask 523264  }
  0x30   :  { %1019 = vmatpush1.bf16.msra.mxu0 %v1018_v12  ;;  %v1402_v56 = vld [vmem:[%s1559_s3] sm:$0xff]   ;;  %v1412_v57 = vld [vmem:[%s1557_s1 + $0x18] sm:$0xff]  ;;  %v1418_v59 = vld [vmem:[%s1559_s3 + $0x8] sm:$0xff]   ;;  %196 = vst.msk [vmem:[#allocation3] sm:$0xff] %vm195_vm8, %v1215_v0  ;;  %vm853_vm9 = vcmask 259072   ;;  %vm856_vm10 = vcmask 261126  }
  0x31   :  { %v933_v58 = vunpack.c.l.bf16 %v1402_v56  ;;  %v934_v60 = vunpack.c.h.bf16 %v1402_v56  ;;  %v937_v61 = vunpack.c.l.bf16 %v1418_v59  ;;  %v938_v62 = vunpack.c.h.bf16 %v1418_v59  ;;  %v901_v8 = vld [vmem:[%s1563_s7] ss:$0 sm:$0xff]  ;;  %s1219_s7 = smov 32   ;;  %859 = vst.msk [vmem:[#allocation9 + $0x28] sm:$0x3f] %vm853_vm9, %v1215_v0 }
  0x32   :  { %v917_v11 = vld [vmem:[%s1566_s10] ss:$0 sm:$0xff]  ;;  %857 = vst.msk [vmem:[#allocation9 + $0x18] sm:$0xc0] %vm856_vm10, %v1215_v0 }
  0x33   :  { %894 = vmatmul.mubr.msk.f32.vlgmr.msra.gmra.mrb[0].mxu0 %vm105_vm0, %v1335_v13 }
  0x34   :  { %182 = vmatprep.mubr.f32.mxu0 %v1215_v0 }
  0x37   :  { %895 = vmatmul.mubr.msk.f32.gmra.mrb[2].mxu0 %vm105_vm0, %v84_v14  ;;  %v918_v14 = vld [vmem:[%s1567_s11] ss:$0 sm:$0xff] }
 0x106   :  { %v178_v22 = vpop.f32.mrb[0].mxu0 }
 0x107   :  { %v1344_v23 = vadd.f32 %v178_v22, %v98_v20  ;;  %v180_v24 = vpop.f32.mrb[1].mxu0 }
 0x108   :  { %v181_v25 = vadd.f32 %v180_v24, %v102_v21 }
 0x10a   :  { %191 = vst.msk [vmem:[#allocation2 + $0x8] sm:$0xff] %vm190_vm1, %v181_v25  ;;  %v184_v26 = vpop.f32.mrb[2].mxu0 }
 0x10b   :  { %v185_v27 = vadd.f32 %v184_v26, %v98_v20  ;;  %v186_v28 = vpop.f32.mrb[3].mxu0 }
 0x10c   :  { %v187_v29 = vadd.f32 %v186_v28, %v102_v21 }
 0x10d   :  { %192 = vst [vmem:[#allocation2 + $0x10] sm:$0x3f] %v185_v27 }
 0x10e   :  { %194 = vst.msk [vmem:[#allocation2 + $0x18] sm:$0x3f] %vm193_vm2, %v187_v29 }
 0x114   :  { %v1350_v32 = vld [vmem:[#allocation2 + $0x10] sm:$0x3f] }
 0x115   :  { %v1073_v33 = vpack.i.bf16 %v1350_v32, %v1344_v23 }
 0x117   :  { %1074 = vrot.lane.b32.xlu0 %v1073_v33, %s1216_s5 }
 0x11b   :  { %1079 = vrot.lane.b32.xlu0 %v1073_v33, %s1217_s21 }
 0x189   :  { %v1075_v34 = vpop.permute.xlu0 %1074 }
 0x18a   :  { %v1077_v37 = vunpack.i.h.bf16 %v1075_v34  ;;  %v1076_v38 = vunpack.i.l.bf16 %v1075_v34 }
 0x18c   :  { %v1020_v40 = vpack.c.bf16 %v1077_v37, %v1076_v38 }
 0x18d   :  { %v1080_v46 = vpop.permute.xlu0 %1079 }
 0x18e   :  { %1022 = vmatprep.subr.msk.bf16.mxu1 %vm1362_vm6, %v1020_v40  ;;  %v1082_v49 = vunpack.i.h.bf16 %v1080_v46  ;;  %v1081_v50 = vunpack.i.l.bf16 %v1080_v46 }
 0x18f   :  { %1025 = vmatpush3.bf16.msk.msra.mxu1 %vm1362_vm6, %v1020_v40 }
 0x190   :  { %1027 = vmatprep.subr.bf16.mxu1 %v1026_v41  ;;  %v1034_v53 = vpack.c.bf16 %v1082_v49, %v1081_v50 }
 0x192   :  { %972 = vmatmul.mubr.msk.f32.vlgmr.msra.gmra.mrb[0].mxu1 %vm226_vm3, %v926_v45 }
 0x193   :  { %1029 = vmatpush3.bf16.msra.mxu1 %v1026_v41  ;;  %974 = vmatprep.mubr.msk.f32.mxu1 %vm226_vm3, %v929_v47 }
 0x194   :  { %1031 = vmatprep.subr.bf16.mxu1 %v1030_v48 }
 0x196   :  { %975 = vmatmul.mubr.msk.f32.gmra.mrb[2].mxu1 %vm226_vm3, %v930_v51 }
 0x197   :  { %1033 = vmatpush3.bf16.msra.mxu1 %v1030_v48  ;;  %985 = vmatprep.mubr.msk.f32.mxu1 %vm105_vm0, %v1384_v52 }
 0x198   :  { %1036 = vmatprep.subr.msk.bf16.mxu1 %vm1362_vm6, %v1034_v53 }
 0x19a   :  { %986 = vmatmul.mubr.msk.f32.vlgmr.msra.gmra.mrb[4].mxu1 %vm105_vm0, %v328_v54 }
 0x19b   :  { %1039 = vmatpush3.bf16.msk.msra.mxu1 %vm1362_vm6, %v1034_v53  ;;  %988 = vmatprep.mubr.msk.f32.mxu1 %vm105_vm0, %v1397_v55 }
 0x19e   :  { %989 = vmatmul.mubr.msk.f32.gmra.mrb[6].mxu1 %vm105_vm0, %v1412_v57 }
 0x19f   :  { %995 = vmatprep.mubr.msk.f32.mxu1 %vm226_vm3, %v933_v58 }
 0x1a2   :  { %996 = vmatmul.mubr.msk.f32.vlgmr.msra.gmra.mrb[4].mxu1 %vm226_vm3, %v934_v60 }
 0x1a3   :  { %998 = vmatprep.mubr.msk.f32.mxu1 %vm226_vm3, %v937_v61 }
 0x1a6   :  { %999 = vmatmul.mubr.msk.f32.gmra.mrb[6].mxu1 %vm226_vm3, %v938_v62 }
 0x265   :  { %v1437_v63 = vpop.f32.mrb[0].mxu1 }
 0x266   :  { %451 = vrot.lane.b32.xlu1 %v1437_v63, %s1217_s21  ;;  %v1441_v1 = vpop.f32.mrb[1].mxu1 }
 0x269   :  { %v1443_v2 = vpop.f32.mrb[2].mxu1 }
 0x26a   :  { %449 = vrot.lane.b32.xlu1 %v1441_v1, %s1217_s21  ;;  %v1447_v3 = vpop.f32.mrb[3].mxu1 }
 0x26b   :  { %453 = vrot.lane.b32.xlu0 %v1447_v3, %s1217_s21 }
 0x26e   :  { %455 = vrot.lane.b32.xlu1 %v1443_v2, %s1217_s21 }
 0x275   :  { %v997_v4 = vpop.f32.mrb[4].mxu1 }
 0x276   :  { %v541_v5 = vpop.f32.mrb[5].mxu1 }
 0x279   :  { %v1000_v6 = vpop.f32.mrb[6].mxu1 }
 0x27a   :  { %v551_v7 = vpop.f32.mrb[7].mxu1 }
 0x2d8   :  { %v452_v9 = vpop.permute.xlu1 %451 }
 0x2d9   :  { %v1048_v10 = vadd.f32 %v901_v8, %v452_v9 }
 0x2db   :  { %v1049_v12 = vadd.f32 %v1048_v10, %v997_v4 }
 0x2dc   :  { %v450_v15 = vpop.permute.xlu1 %449 }
 0x2dd   :  { %v912_v16 = vmul.f32 -1.442695, %v1049_v12  ;;  %v741_v17 = vmul.f32 %v1049_v12, %v917_v11  ;;  %v1050_v18 = vadd.f32 %v901_v8, %v450_v15  ;;  %v454_v19 = vpop.permute.xlu0 %453 }
 0x2de   :  { %v1054_v20 = vadd.f32 %v901_v8, %v454_v19 }
 0x2df   :  { %1093 = vpow2.f32 %v912_v16  ;;  %v752_v21 = vadd.f32 %v918_v14, %v741_v17  ;;  %v1051_v22 = vadd.f32 %v1050_v18, %v541_v5  ;;  %v613_v16 = vld [vmem:[#allocation3 + $0x8] sm:$0x3f]  ;;  %v612_v17 = vld [vmem:[#allocation3] sm:$0xff] }
 0x2e0   :  { %v1055_v24 = vadd.f32 %v1054_v20, %v551_v7  ;;  %v456_v25 = vpop.permute.xlu1 %455 }
 0x2e1   :  { %v756_v26 = vmax.f32 %v752_v21, 0.0  ;;  %v911_v27 = vmul.f32 -1.442695, %v1051_v22  ;;  %v740_v28 = vmul.f32 %v1051_v22, %v917_v11  ;;  %v1052_v29 = vadd.f32 %v901_v8, %v456_v25 }
 0x2e2   :  { %v913_v30 = vmul.f32 -1.442695, %v1055_v24  ;;  %v742_v31 = vmul.f32 %v1055_v24, %v917_v11 }
 0x2e3   :  { %v760_v33 = vadd.f32 %v756_v26, %v328_v54  ;;  %1095 = vpow2.f32 %v911_v27  ;;  %v751_v34 = vadd.f32 %v918_v14, %v740_v28  ;;  %v1053_v35 = vadd.f32 %v1052_v29, %v1000_v6  ;;  %v200_v27 = vld [vmem:[#allocation2 + $0x8] sm:$0xff] }
 0x2e4   :  { %1097 = vpow2.f32 %v913_v30  ;;  %v753_v36 = vadd.f32 %v918_v14, %v742_v31 }
 0x2e5   :  { %764 = vst.msk [vmem:[#allocation10 + $0x8] sm:$0xff] %vm105_vm0, %v760_v33  ;;  %v755_v37 = vmax.f32 %v751_v34, 0.0  ;;  %v914_v38 = vmul.f32 -1.442695, %v1053_v35  ;;  %v743_v39 = vmul.f32 %v1053_v35, %v917_v11  ;;  %v919_v34 = vld [vmem:[%s1564_s8] ss:$0 sm:$0xff] }
 0x2e6   :  { %v757_v40 = vmax.f32 %v753_v36, 0.0 }
 0x2e7   :  { %v759_v41 = vadd.f32 %v755_v37, %v1384_v52  ;;  %1099 = vpow2.f32 %v914_v38  ;;  %v754_v42 = vadd.f32 %v918_v14, %v743_v39  ;;  %v920_v37 = vld [vmem:[%s1565_s9] ss:$0 sm:$0xff]  ;;  %s1220_s9 = smov [#allocation10]  }
 0x2e8   :  { %v761_v43 = vadd.f32 %v757_v40, %v1397_v55  ;;  %s877_s22 = sshll.u32 %s1220_s9, 4  ;;  %s878_s22 = int_to_ptr.vmem [resolvable:$true] %s877_s22 }
 0x2e9   :  { %v1094_v44 = vpop.eup %1093  ;;  %763 = vst.msk [vmem:[#allocation10] sm:$0xff] %vm105_vm0, %v759_v41  ;;  %v758_v45 = vmax.f32 %v754_v42, 0.0  ;;  %s1157_s25 = scalar_lea.vmem %s878_s22, 512  ;;  %p1162_p3 = scmp.lt.s32.totalorder %s878_s22, %s878_s22 }
 0x2ea   :  { %v577_v46 = vadd.f32 1.0, %v1094_v44  ;;  %765 = vst.msk [vmem:[#allocation10 + $0x10] sm:$0xff] %vm105_vm0, %v761_v43  ;;  %p1158_p2 = scmp.ne.s32.totalorder %s878_s22, %s1157_s25  ;;  %p1163_p4 = scmp.lt.s32.totalorder %s1157_s25, %s1157_s25 }
 0x2eb   :  { %v762_v47 = vadd.f32 %v758_v45, %v1412_v57  ;;  %v771_v45 = vld [vmem:[#allocation4 + $0x8] sm:$0x3f] }
 0x2ec   :  { %1101 = vrcp.f32 %v577_v46  ;;  %p1164_p5 = por %p1163_p4, %p1162_p3 }
 0x2ed   :  { %v1096_v48 = vpop.eup %1095  ;;  %766 = vst.msk [vmem:[#allocation10 + $0x18] sm:$0xff] %vm105_vm0, %v762_v47 }
 0x2ee   :  { %v1098_v49 = vpop.eup %1097  ;;  %v576_v50 = vadd.f32 1.0, %v1096_v48  ;;  %p1165_p6 = pnand %p1164_p5, %p1158_p2 }
 0x2ef   :  { %v578_v51 = vadd.f32 1.0, %v1098_v49  ;;  %v922_v49 = vld [vmem:[%s1569_s13] ss:$0 sm:$0xff] }
 0x2f0   :  { %1103 = vrcp.f32 %v576_v50 }
 0x2f1   :  { %v1100_v52 = vpop.eup %1099  ;;  %1105 = vrcp.f32 %v578_v51 }
 0x2f2   :  { %v579_v53 = vadd.f32 1.0, %v1100_v52 }
 0x2f4   :  { %1107 = vrcp.f32 %v579_v53 }
 0x2f6   :  { %v1102_v54 = vpop.eup %1101 }
 0x2f7   :  { %v589_v55 = vmul.f32 %v1102_v54, %v1437_v63 }
 0x2fa   :  { %v1104_v4 = vpop.eup %1103 }
 0x2fb   :  { %v1106_v5 = vpop.eup %1105  ;;  %v1083_v6 = vpack.i.bf16 %v1102_v54, %v1104_v4  ;;  %v588_v57 = vmul.f32 %v1104_v4, %v1441_v1 }
 0x2fc   :  { %v590_v7 = vmul.f32 %v1106_v5, %v1447_v3 }
 0x2fd   :  { %1084 = vrot.lane.b32.xlu0 %v1083_v6, %s1219_s7 }
 0x2fe   :  { %v1108_v8 = vpop.eup %1107 }
 0x2ff   :  { %v1088_v9 = vpack.i.bf16 %v1108_v8, %v1106_v5  ;;  %v591_v10 = vmul.f32 %v1108_v8, %v1443_v2 }
 0x301   :  { %1089 = vrot.lane.b32.xlu1 %v1088_v9, %s1219_s7 }
 0x31b   :  { %614 = vxpose.xlu0.b32.start [1/4] (short) (narrow) %v933_v58, 16 }
 0x31f   :  { %615 = vxpose.xlu0.b32.cont [2/4] (short) (narrow) %v934_v60, 16 }
 0x323   :  { %616 = vxpose.xlu0.b32.cont [3/4] (short) (narrow) %v937_v61, 16 }
 0x327   :  { %617 = vxpose.xlu0.b32.end [4/4] (short) (narrow) %v938_v62, 16 }
 0x36f   :  { %v1085_v63 = vpop.permute.xlu0 %1084 }
 0x370   :  { %v1087_v1 = vunpack.i.h.bf16 %v1085_v63  ;;  %v1086_v2 = vunpack.i.l.bf16 %v1085_v63 }
 0x372   :  { %v608_v3 = vsel %vm105_vm0, %v588_v57, %v1086_v2  ;;  %v609_v58 = vsel %vm105_vm0, %v589_v55, %v1087_v1 }
 0x373   :  { %v1090_v11 = vpop.permute.xlu1 %1089  ;;  %v1040_v56 = vpack.c.bf16 %v609_v58, %v608_v3 }
 0x374   :  { %v1092_v60 = vunpack.i.h.bf16 %v1090_v11  ;;  %v1091_v12 = vunpack.i.l.bf16 %v1090_v11 }
 0x375   :  { %1041 = vmatprep.subr.bf16.mxu0 %v1040_v56 }
 0x376   :  { %1043 = vmatpush3.bf16.msra.mxu0 %v1040_v56  ;;  %v610_v14 = vsel %vm105_vm0, %v590_v7, %v1091_v12  ;;  %v611_v61 = vsel %vm105_vm0, %v591_v10, %v1092_v60 }
 0x377   :  { %v1044_v15 = vpack.c.bf16 %v611_v61, %v610_v14 }
 0x379   :  { %1045 = vmatprep.subr.bf16.mxu0 %v1044_v15 }
 0x37a   :  { %1047 = vmatpush3.bf16.msra.mxu0 %v1044_v15 }
 0x39b   :  { %v630_v59 = vpop.trf.xlu0 }
 0x39c   :  { %1009 = vmatprep.mubr.msk.f32.mxu0 %vm105_vm0, %v630_v59 }
 0x39f   :  { %v631_v62 = vpop.trf.xlu0 }
 0x3a0   :  { %1010 = vmatmul.mubr.msk.f32.vlgmr.msra.gmra.mrb[4].mxu0 %vm105_vm0, %v631_v62 }
 0x473   :  { %v1011_v18 = vpop.f32.mrb[4].mxu0 }
 0x474   :  { %v728_v19 = vadd.f32 %v1011_v18, %v613_v16  ;;  %v718_v20 = vpop.f32.mrb[5].mxu0 }
 0x475   :  { %v727_v21 = vadd.f32 %v718_v20, %v612_v17 }
 0x476   :  { %732 = vst.msk [vmem:[#allocation3 + $0x8] sm:$0x3f] %vm197_vm7, %v728_v19 }
 0x477   :  { %730 = vst.msk [vmem:[#allocation3] sm:$0xff] %vm195_vm8, %v727_v21 }
 0x47d   :  { %v773_v25 = vld [vmem:[#allocation3 + $0x8] sm:$0x3f] }
 0x47e   :  { %v772_v22 = vld [vmem:[#allocation3] sm:$0xff]  ;;  %v775_v26 = vadd.f32 1e-06, %v773_v25 }
 0x47f   :  { %v774_v24 = vadd.f32 1e-06, %v772_v22 }
 0x481   :  { %778 = vrot.lane.b32.xlu1 %v774_v24, %s1217_s21 }
 0x485   :  { %780 = vrot.lane.b32.xlu1 %v775_v26, %s1217_s21 }
 0x489   :  { %840 = vrot.lane.b32.xlu1 %v200_v27, %s1216_s5 }
 0x4f3   :  { %v779_v28 = vpop.permute.xlu1 %778 }
 0x4f4   :  { %1109 = vrcp.f32 %v779_v28 }
 0x4f7   :  { %v781_v29 = vpop.permute.xlu1 %780 }
 0x4f8   :  { %1111 = vrcp.f32 %v781_v29 }
 0x4fb   :  { %v841_v30 = vpop.permute.xlu1 %840 }
 0x4fc   :  { %851 = vst.msk [vmem:[#allocation9 + $0x8] sm:$0xff] %vm105_vm0, %v841_v30 }
 0x4fe   :  { %v1110_v31 = vpop.eup %1109 }
 0x4ff   :  { %v785_v33 = vmul.f32 %v1110_v31, %v772_v22 }
 0x501   :  { %v788_v35 = vadd.f32 %v785_v33, %v1344_v23  ;;  %v921_v23 = vld [vmem:[%s1568_s12] ss:$0 sm:$0xff] }
 0x502   :  { %v1112_v36 = vpop.eup %1111 }
 0x503   :  { %v787_v38 = vmul.f32 %v1112_v36, %v773_v25  ;;  %v797_v39 = vmul.f32 %v919_v34, %v788_v35 }
 0x505   :  { %v789_v40 = vadd.f32 %v787_v38, %v1350_v32  ;;  %v806_v41 = vadd.f32 %v920_v37, %v797_v39 }
 0x507   :  { %v798_v42 = vmul.f32 %v919_v34, %v789_v40  ;;  %v808_v44 = vmax.f32 %v806_v41, 0.0 }
 0x509   :  { %v807_v43 = vadd.f32 %v920_v37, %v798_v42  ;;  %v810_v48 = vadd.f32 %v808_v44, %v1335_v13 }
 0x50b   :  { %v809_v46 = vmax.f32 %v807_v43, 0.0 }
 0x50d   :  { %v811_v47 = vadd.f32 %v809_v46, %v771_v45 }
 0x50f   :  { %v820_v32 = vmul.f32 %v921_v23, %v811_v47 }
 0x510   :  { %1168 = shalt.err (!%p1165_p6)
}
 0x511   :  { %s1169_s27 = scalar_lea.hbm %s1571_s15, 512 }
 0x512   :  { %p1170_p7 = scmp.ne.s32.totalorder %s1571_s15, %s1169_s27  ;;  %p1173_p8 = scmp.lt.u32.totalorder %s1169_s27, %s1571_s15 }
 0x514   :  { %p1175_p9 = pnand %p1173_p8, %p1170_p7 }
 0x516   :  { %1178 = shalt.err (!%p1175_p9)
}
 0x517   :  { %883 = dma.vmem_to_hbm [thread:$0]  %s878_s22, 512, %s1571_s15, [#allocation11], %s1210_s28, %s1210_s28, %s1211_s29   ;;  %v829_v0 = vadd.f32 %v922_v49, %v820_v32  ;;  %v819_v50 = vmul.f32 %v921_v23, %v810_v48  ;;  %v202_v52 = vld [vmem:[#allocation2 + $0x18] sm:$0x3f] }
 0x518   :  { %s1221_s17 = smov [#allocation9]  }
 0x519   :  { %834 = vrot.lane.b32.xlu1 %v829_v0, %s1219_s7  ;;  %v828_v51 = vadd.f32 %v922_v49, %v819_v50  ;;  %s865_s2 = sshll.u32 %s1221_s17, 4  ;;  %s866_s2 = int_to_ptr.vmem [resolvable:$true] %s865_s2 }
 0x51a   :  { %s1179_s15 = scalar_lea.vmem %s866_s2, 768  ;;  %p1184_p11 = scmp.lt.s32.totalorder %s866_s2, %s866_s2 }
 0x51b   :  { %p1180_p10 = scmp.ne.s32.totalorder %s866_s2, %s1179_s15  ;;  %p1185_p12 = scmp.lt.s32.totalorder %s1179_s15, %s1179_s15 }
 0x51d   :  { %832 = vrot.lane.b32.xlu1 %v828_v51, %s1219_s7  ;;  %p1186_p13 = por %p1185_p12, %p1184_p11 }
 0x51f   :  { %p1187_p0 = pnand %p1186_p13, %p1180_p10 }
 0x521   :  { %842 = vrot.lane.b32.xlu1 %v202_v52, %s1216_s5 }
 0x58b   :  { %v835_v53 = vpop.permute.xlu1 %834 }
 0x58c   :  { %v847_v5 = vsel %vm105_vm0, %v771_v45, %v835_v53 }
 0x58f   :  { %v833_v54 = vpop.permute.xlu1 %832 }
 0x590   :  { %v846_v55 = vsel %vm105_vm0, %v1335_v13, %v833_v54 }
 0x591   :  { %v848_v4 = vsel %vm195_vm8, %v846_v55, %v841_v30 }
 0x592   :  { %850 = vst [vmem:[#allocation9] sm:$0xff] %v848_v4 }
 0x593   :  { %v843_v6 = vpop.permute.xlu1 %842 }
 0x594   :  { %v849_v57 = vsel %vm195_vm8, %v847_v5, %v843_v6  ;;  %854 = vst.msk [vmem:[#allocation9 + $0x18] sm:$0x3f] %vm853_vm9, %v843_v6 }
 0x595   :  { %852 = vst [vmem:[#allocation9 + $0x10] sm:$0x3f] %v849_v57 }
 0x596   :  { %1190 = shalt.err (!%p1187_p0)
}
 0x597   :  { %s1191_s5 = scalar_lea.hbm %s1570_s14, 768 }
 0x598   :  { %p1192_p1 = scmp.ne.s32.totalorder %s1570_s14, %s1191_s5  ;;  %p1195_p2 = scmp.lt.u32.totalorder %s1191_s5, %s1570_s14 }
 0x59a   :  { %p1197_p3 = pnand %p1195_p2, %p1192_p1 }
 0x59c   :  { %1200 = shalt.err (!%p1197_p3)
}
 0x59d   :  { %871 = dma.vmem_to_hbm [thread:$0]  %s866_s2, 768, %s1570_s14, [#allocation6], %s1213_s0, %s1213_s0, %s1214_s19  }
 0x59e   :  { %1205 = dma.done.wait [#allocation6], 768  }
 0x59f   :  { %1206 = vsyncadd [#allocation6], 4294966528 }
 0x5a0   :  { %1207 = dma.done.wait [#allocation11], 512  }
 0x5a1   :  { %1208 = vsyncadd [#allocation11], 4294966784 }
 0x5a2   :  { %890 = vsyncpa [#allocation5], 1 }
 0x5a3   :  { %891 = vsyncpa [#allocation8], 1 }
 0x5a4   :  { %892 = vsyncpa [#allocation6], 1 }
 0x5a5   :  { %893 = vsyncpa [#allocation11], 1 }

</bundles_post_ra>
